<compile_context>
chip_gen: v7x
topology: tpu7x:2x2x1
jax: 0.10.0
libtpu: 0.0.40
codegen_flags: <defaults>
</compile_context>

<pallas_src>
import math
import functools

import jax
import jax.numpy as jnp
from jax import lax
from jax.experimental import pallas as pl
from jax.experimental.pallas import tpu as pltpu


# ----------------------------------------------------------------------------
# Small helpers
# ----------------------------------------------------------------------------
def _vmem_limit_bytes(working_set_bytes, lo=32 << 20, hi=64 << 20):
    """Scoped-VMEM request: 2x the estimated per-step working set, clamped so
    it is >= the v5e default (16 MiB) and <= v7x physical VMEM (64 MiB)."""
    return int(min(hi, max(lo, 2 * working_set_bytes)))


def _choose_heads_per_group(num_heads, head_dim):
    """Largest divisor of num_heads with heads_per_group*head_dim <= 128 so the
    per-group q/k/v slabs and the context writeback are lane-dense."""
    g = max(1, min(num_heads, 128 // max(1, head_dim)))
    while num_heads % g:
        g -= 1
    return g


def _choose_group_cols(n_group_blocks, group_width, target_cols=1024):
    """How many head-groups' worth of output columns kernel 1 produces per
    grid step (N-tiling of the 3H axis). Must divide 3*n_groups."""
    gn = max(1, min(n_group_blocks, target_cols // max(1, group_width)))
    while n_group_blocks % gn:
        gn -= 1
    return gn


# ----------------------------------------------------------------------------
# Kernel 1: fused Q/K/V projection, tiled over tokens and over the 3H axis.
# Output layout: [3*n_groups, T, group_width] (head-group major, lane-dense).
# ----------------------------------------------------------------------------
def _qkv_proj_kernel(x_ref, w_ref, b_ref, qkv_ref, *, gn, gd):
    # x_ref:   [tile_t, H]
    # w_ref:   [H, gn*gd]          (current N tile of the concatenated weights)
    # b_ref:   [1, gn*gd]
    # qkv_ref: [gn, tile_t, gd]    (gn head-groups, each lane-dense)
    acc = jnp.dot(x_ref[...], w_ref[...], preferred_element_type=jnp.float32)
    acc = acc + b_ref[...].astype(jnp.float32)
    for g in range(gn):                               # static, small (<= ~8)
        qkv_ref[g, :, :] = acc[:, g * gd:(g + 1) * gd].astype(qkv_ref.dtype)


def qkv_projection(x2d, w_qkv, b_qkv, *, group_width, tile_t=256,
                   tile_groups=None):
    """x2d:[T,H], w_qkv:[H,3H], b_qkv:[1,3H] -> [3H/group_width, T_pad, gw]."""
    T, H = x2d.shape
    H3 = w_qkv.shape[1]
    gd = group_width
    G3 = H3 // gd                                     # number of head-groups*3

    # Token tiling; pad with zero rows so tile_t always divides (padded rows
    # are sliced off by the caller before attention).
    if T <= tile_t:
        tile_t = T
    n_t = pl.cdiv(T, tile_t)
    T_pad = n_t * tile_t
    if T_pad != T:
        x2d = jnp.pad(x2d, ((0, T_pad - T), (0, 0)))

    # N-tiling of the 3H output axis (in whole head-groups).
    if tile_groups is None:
        tile_groups = _choose_group_cols(G3, gd)
    gn = tile_groups
    tile_n = gn * gd
    n_n = G3 // gn

    itemsize = jnp.dtype(x2d.dtype).itemsize
    work = 2 * (tile_t * H + H * tile_n + tile_n + tile_t * tile_n) * itemsize
    work += 2 * tile_t * tile_n * 4                   # f32 accumulator + slack

    kernel = functools.partial(_qkv_proj_kernel, gn=gn, gd=gd)
    return pl.pallas_call(
        kernel,
        out_shape=jax.ShapeDtypeStruct((G3, T_pad, gd), x2d.dtype),
        grid=(n_n, n_t),                              # token axis innermost ->
        in_specs=[                                    # W tile revisit-skipped
            pl.BlockSpec((tile_t, H), lambda n, i: (i, 0)),
            pl.BlockSpec((H, tile_n), lambda n, i: (0, n)),
            pl.BlockSpec((1, tile_n), lambda n, i: (0, n)),
        ],
        out_specs=pl.BlockSpec((gn, tile_t, gd), lambda n, i: (n, i, 0)),
        compiler_params=pltpu.CompilerParams(
            dimension_semantics=("parallel", "parallel"),
            vmem_limit_bytes=_vmem_limit_bytes(work)),
    )(x2d, w_qkv, b_qkv)


# ----------------------------------------------------------------------------
# Kernel 2: attention, grid over (batch, head-group, q-row tile).
# ----------------------------------------------------------------------------
def _attention_kernel(q_ref, k_ref, v_ref, o_ref, *, heads_per_group, head_dim):
    # q_ref: [tq, gd]   k_ref/v_ref: [S, gd]   o_ref: [tq, gd]   (gd = g*D)
    d = head_dim
    parts = []
    for h in range(heads_per_group):                  # static, small (1-2)
        q = q_ref[:, h * d:(h + 1) * d]               # scale already folded in
        k = k_ref[:, h * d:(h + 1) * d]
        v = v_ref[:, h * d:(h + 1) * d]

        # scores = q @ k^T without materializing a transpose of k.
        scores = lax.dot_general(
            q, k, dimension_numbers=(((1,), (1,)), ((), ())),
            preferred_element_type=jnp.float32)       # [tq, S] f32

        m = jnp.max(scores, axis=-1, keepdims=True)
        e = jnp.exp(scores - m)
        denom = jnp.sum(e, axis=-1, keepdims=True)
        probs = e * pl.reciprocal(denom, approx=True)

        parts.append(jnp.dot(probs.astype(v.dtype), v,
                             preferred_element_type=jnp.float32))  # [tq, D]

    ctx = parts[0] if len(parts) == 1 else jnp.concatenate(parts, axis=-1)
    o_ref[...] = ctx.astype(o_ref.dtype)              # single lane-dense store


def attention(qkv5, *, heads_per_group, head_dim, out_dtype, tile_q=256):
    """qkv5: [3, n_groups, B, S, gd] -> context [B, S, H]."""
    _, n_groups, B, S, gd = qkv5.shape
    H = n_groups * gd

    if S <= tile_q or S % tile_q:
        tile_q = S        # TODO(synk): pad/mask path for awkward S; flash for long S
    n_q = S // tile_q

    itemsize = jnp.dtype(qkv5.dtype).itemsize
    work = 2 * (tile_q * gd + 2 * S * gd) * itemsize          # q + k + v blocks
    work += 2 * tile_q * gd * jnp.dtype(out_dtype).itemsize   # out block
    work += 4 * tile_q * S * 4 + heads_per_group * tile_q * head_dim * 4

    kernel = functools.partial(_attention_kernel,
                               heads_per_group=heads_per_group,
                               head_dim=head_dim)
    return pl.pallas_call(
        kernel,
        out_shape=jax.ShapeDtypeStruct((B, S, H), out_dtype),
        grid=(B, n_groups, n_q),                      # q tiles innermost ->
        in_specs=[                                    # K/V blocks revisit-skipped
            pl.BlockSpec((None, None, None, tile_q, gd),
                         lambda b, g, qi: (0, g, b, qi, 0)),   # q slice
            pl.BlockSpec((None, None, None, S, gd),
                         lambda b, g, qi: (1, g, b, 0, 0)),    # k (whole S)
            pl.BlockSpec((None, None, None, S, gd),
                         lambda b, g, qi: (2, g, b, 0, 0)),    # v (whole S)
        ],
        out_specs=pl.BlockSpec((None, tile_q, gd),
                               lambda b, g, qi: (b, qi, g)),
        compiler_params=pltpu.CompilerParams(
            dimension_semantics=("parallel", "parallel", "parallel"),
            vmem_limit_bytes=_vmem_limit_bytes(work)),
    )(qkv5, qkv5, qkv5)


# ----------------------------------------------------------------------------
# Module wrapper
# ----------------------------------------------------------------------------
def prepare_qkv_params(params, num_heads, compute_dtype=jnp.bfloat16):
    """One-time parameter prep (cache the result across forward calls):
    concatenate Wq|Wk|Wv, fold 1/sqrt(D) into the q columns, cast to the
    MXU-native compute dtype."""
    H = params["wq"].shape[0]
    D = H // num_heads
    scale = 1.0 / math.sqrt(D)
    w_qkv = jnp.concatenate(
        [params["wq"] * scale, params["wk"], params["wv"]],
        axis=1).astype(compute_dtype)
    b_qkv = jnp.concatenate(
        [params["bq"].reshape(1, -1) * scale,
         params["bk"].reshape(1, -1),
         params["bv"].reshape(1, -1)],
        axis=1).astype(compute_dtype)
    return w_qkv, b_qkv


def bert_self_attention(hidden_states, w_qkv, b_qkv, num_heads,
                        tile_t=256, tile_q=256):
    """hidden_states: [B, S, H] -> context [B, S, H] (eval mode, no mask)."""
    B, S, H = hidden_states.shape
    assert H % num_heads == 0
    D = H // num_heads
    compute_dtype = w_qkv.dtype

    heads_per_group = _choose_heads_per_group(num_heads, D)
    gd = heads_per_group * D
    n_groups = num_heads // heads_per_group

    x2d = hidden_states.astype(compute_dtype).reshape(B * S, H)  # free reshape
    qkv = qkv_projection(x2d, w_qkv, b_qkv, group_width=gd,
                         tile_t=tile_t)               # [3*n_groups, T_pad, gd]
    T = B * S
    if qkv.shape[1] != T:                             # drop token padding
        qkv = qkv[:, :T, :]
    qkv5 = qkv.reshape(3, n_groups, B, S, gd)         # free reshape

    return attention(qkv5, heads_per_group=heads_per_group, head_dim=D,
                     out_dtype=hidden_states.dtype, tile_q=tile_q)


# ----------------------------------------------------------------------------
# Pure-JAX reference (for correctness check)
# ----------------------------------------------------------------------------
def bert_self_attention_ref(hidden_states, params, num_heads):
    B, S, H = hidden_states.shape
    D = H // num_heads
    q = hidden_states @ params["wq"] + params["bq"]
    k = hidden_states @ params["wk"] + params["bk"]
    v = hidden_states @ params["wv"] + params["bv"]
    to_heads = lambda t: t.reshape(B, S, num_heads, D).transpose(0, 2, 1, 3)
    qh, kh, vh = to_heads(q), to_heads(k), to_heads(v)
    scores = jnp.einsum("bhqd,bhkd->bhqk", qh, kh) / math.sqrt(D)
    probs = jax.nn.softmax(scores, axis=-1)
    ctx = jnp.einsum("bhqk,bhkd->bhqd", probs, vh)
    return ctx.transpose(0, 2, 1, 3).reshape(B, S, H)


if __name__ == "__main__":
    # Small BERT-ish config
    batch, seq, hidden, num_heads = 2, 8, 32, 4

    key = jax.random.PRNGKey(0)
    kx, kq, kk, kv, kbq, kbk, kbv = jax.random.split(key, 7)

    x = jax.random.normal(kx, (batch, seq, hidden), dtype=jnp.float32)

    s = 1.0 / math.sqrt(hidden)
    params = {
        "wq": jax.random.uniform(kq, (hidden, hidden), jnp.float32, -s, s),
        "wk": jax.random.uniform(kk, (hidden, hidden), jnp.float32, -s, s),
        "wv": jax.random.uniform(kv, (hidden, hidden), jnp.float32, -s, s),
        "bq": jax.random.uniform(kbq, (1, hidden), jnp.float32, -s, s),
        "bk": jax.random.uniform(kbk, (1, hidden), jnp.float32, -s, s),
        "bv": jax.random.uniform(kbv, (1, hidden), jnp.float32, -s, s),
    }

    ref = bert_self_attention_ref(x, params, num_heads)

    # Default (production) path: bf16 compute, f32 accumulation, f32 output.
    w_bf16, b_bf16 = prepare_qkv_params(params, num_heads, jnp.bfloat16)
    out = bert_self_attention(x, w_bf16, b_bf16, num_heads)
    out = jax.block_until_ready(out)
    assert out.shape == (batch, seq, hidden)
    assert out.dtype == x.dtype
    assert jnp.allclose(out.astype(jnp.float32), ref, atol=6e-2, rtol=6e-2), \
        "bf16 mismatch vs ref"

    # f32 compute path (tolerance accounts for the approximate EUP reciprocal).
    w_f32, b_f32 = prepare_qkv_params(params, num_heads, jnp.float32)
    out_f32 = bert_self_attention(x, w_f32, b_f32, num_heads)
    out_f32 = jax.block_until_ready(out_f32)
    assert jnp.allclose(out_f32, ref, atol=1e-2, rtol=1e-2), "f32 mismatch vs ref"

    print("KERNEL_OK")
</pallas_src>

<mosaic_0001>
module attributes {stable_mosaic.version = 11 : i64} {
  func.func @_qkv_proj_kernel(%arg0: i32, %arg1: i32, %arg2: memref<16x32xbf16, #tpu.memory_space<vmem>>, %arg3: memref<32x96xbf16, #tpu.memory_space<vmem>>, %arg4: memref<1x96xbf16, #tpu.memory_space<vmem>>, %arg5: memref<3x16x32xbf16, #tpu.memory_space<vmem>>) attributes {dimension_semantics = [#tpu.dimension_semantics<parallel>, #tpu.dimension_semantics<parallel>], iteration_bounds = array<i64: 1, 1>, scalar_prefetch = 0 : i64, scratch_operands = 0 : i64, tpu.core_type = #tpu.core_type<tc>, window_params = [{transform_indices = @transform_0, window_bounds = array<i64: 16, 32>}, {transform_indices = @transform_1, window_bounds = array<i64: 32, 96>}, {transform_indices = @transform_2, window_bounds = array<i64: 1, 96>}, {transform_indices = @transform_3, window_bounds = array<i64: 3, 16, 32>}]} {
    %c0 = arith.constant 0 : index
    %c0_0 = arith.constant 0 : index
    %0 = vector.load %arg2[%c0, %c0_0] : memref<16x32xbf16, #tpu.memory_space<vmem>>, vector<16x32xbf16>
    %c0_1 = arith.constant 0 : index
    %c0_2 = arith.constant 0 : index
    %1 = vector.load %arg3[%c0_1, %c0_2] : memref<32x96xbf16, #tpu.memory_space<vmem>>, vector<32x96xbf16>
    %cst = arith.constant dense<0.000000e+00> : vector<16x96xf32>
    %2 = tpu.matmul %0, %1, %cst {dimension_numbers = #tpu.dot_dimension_numbers<[1], [0], [0], [1], [0, 0, 1, 1], [], []>} : vector<16x32xbf16>, vector<32x96xbf16>, vector<16x96xf32> -> vector<16x96xf32>
    %c0_3 = arith.constant 0 : index
    %c0_4 = arith.constant 0 : index
    %3 = vector.load %arg4[%c0_3, %c0_4] : memref<1x96xbf16, #tpu.memory_space<vmem>>, vector<1x96xbf16>
    %4 = arith.extf %3 : vector<1x96xbf16> to vector<1x96xf32>
    %5 = vector.broadcast %4 : vector<1x96xf32> to vector<16x96xf32>
    %6 = arith.addf %2, %5 : vector<16x96xf32>
    %7 = vector.extract_strided_slice %6 {offsets = [0, 0], sizes = [16, 32], strides = [1, 1]} : vector<16x96xf32> to vector<16x32xf32>
    %8 = arith.truncf %7 : vector<16x32xf32> to vector<16x32xbf16>
    %c0_5 = arith.constant 0 : index
    %c0_6 = arith.constant 0 : index
    %c0_7 = arith.constant 0 : index
    %9 = vector.load %arg5[%c0_5, %c0_6, %c0_7] : memref<3x16x32xbf16, #tpu.memory_space<vmem>>, vector<1x16x32xbf16>
    %10 = vector.shape_cast %9 : vector<1x16x32xbf16> to vector<16x32xbf16>
    %11 = vector.shape_cast %8 : vector<16x32xbf16> to vector<1x16x32xbf16>
    tpu.vector_store %arg5[%c0_5, %c0_6, %c0_7], %11 {strides = array<i32>} : memref<3x16x32xbf16, #tpu.memory_space<vmem>>, vector<1x16x32xbf16>,
    %12 = vector.extract_strided_slice %6 {offsets = [0, 32], sizes = [16, 32], strides = [1, 1]} : vector<16x96xf32> to vector<16x32xf32>
    %13 = arith.truncf %12 : vector<16x32xf32> to vector<16x32xbf16>
    %c1 = arith.constant 1 : index
    %c0_8 = arith.constant 0 : index
    %c0_9 = arith.constant 0 : index
    %14 = vector.load %arg5[%c1, %c0_8, %c0_9] : memref<3x16x32xbf16, #tpu.memory_space<vmem>>, vector<1x16x32xbf16>
    %15 = vector.shape_cast %14 : vector<1x16x32xbf16> to vector<16x32xbf16>
    %16 = vector.shape_cast %13 : vector<16x32xbf16> to vector<1x16x32xbf16>
    tpu.vector_store %arg5[%c1, %c0_8, %c0_9], %16 {strides = array<i32>} : memref<3x16x32xbf16, #tpu.memory_space<vmem>>, vector<1x16x32xbf16>,
    %17 = vector.extract_strided_slice %6 {offsets = [0, 64], sizes = [16, 32], strides = [1, 1]} : vector<16x96xf32> to vector<16x32xf32>
    %18 = arith.truncf %17 : vector<16x32xf32> to vector<16x32xbf16>
    %c2 = arith.constant 2 : index
    %c0_10 = arith.constant 0 : index
    %c0_11 = arith.constant 0 : index
    %19 = vector.load %arg5[%c2, %c0_10, %c0_11] : memref<3x16x32xbf16, #tpu.memory_space<vmem>>, vector<1x16x32xbf16>
    %20 = vector.shape_cast %19 : vector<1x16x32xbf16> to vector<16x32xbf16>
    %21 = vector.shape_cast %18 : vector<16x32xbf16> to vector<1x16x32xbf16>
    tpu.vector_store %arg5[%c2, %c0_10, %c0_11], %21 {strides = array<i32>} : memref<3x16x32xbf16, #tpu.memory_space<vmem>>, vector<1x16x32xbf16>,
    return
  }
  func.func @transform_0(%arg0: i32, %arg1: i32) -> (i32, i32) {
    %c0_i32 = arith.constant 0 : i32
    %c0_i32_0 = arith.constant 0 : i32
    return %arg1, %c0_i32 : i32, i32
  }
  func.func @transform_1(%arg0: i32, %arg1: i32) -> (i32, i32) {
    %c0_i32 = arith.constant 0 : i32
    %c0_i32_0 = arith.constant 0 : i32
    return %c0_i32, %arg0 : i32, i32
  }
  func.func @transform_2(%arg0: i32, %arg1: i32) -> (i32, i32) {
    %c0_i32 = arith.constant 0 : i32
    %c0_i32_0 = arith.constant 0 : i32
    return %c0_i32, %arg0 : i32, i32
  }
  func.func @transform_3(%arg0: i32, %arg1: i32) -> (i32, i32, i32) {
    %c0_i32 = arith.constant 0 : i32
    %c0_i32_0 = arith.constant 0 : i32
    return %arg0, %arg1, %c0_i32 : i32, i32, i32
  }
}

</mosaic_0001>

<bundles_post_ra>
// kernel: tpu_custom_call.1
= control target key start
LH: loop header
LB: loop body
LE: loop exit
PB: predicated region body
PF: predicated region fallthrough
CT: control target
= control target key end

     0   :  { %8 = vsyncpa [#allocation3], 0  ;;  %s351_s0 = inlined_call_operand.hbm [shape: bf16[16,32], index: 0, kind: input, shape index: {}]   ;;  %s352_s1 = inlined_call_operand.hbm [shape: bf16[32,96], index: 1, kind: input, shape index: {}]   ;;  %s353_s2 = inlined_call_operand.vmem [shape: bf16[1,96], index: 2, kind: input, shape index: {}]   ;;  %s354_s3 = inlined_call_operand.hbm [shape: bf16[3,16,32], index: 3, kind: output, shape index: {}]  }
   0x1   :  { %9 = vsyncpa [#allocation6], 0 }
   0x2   :  { %10 = vsyncpa [#allocation4], 0  ;;  %s267_s12 = smov [#allocation2]   ;;  %s195_s16 = scalar_lea.hbm %s351_s0, 128 }
   0x3   :  { %s16_s13 = sshll.u32 %s267_s12, 4  ;;  %p196_p0 = scmp.ne.s32.totalorder %s351_s0, %s195_s16  ;;  %s17_s13 = int_to_ptr.vmem [resolvable:$true] %s16_s13 }
   0x4   :  { %p199_p1 = scmp.lt.u32.totalorder %s195_s16, %s351_s0 }
   0x6   :  { %p201_p2 = pnand %p199_p1, %p196_p0 }
   0x8   :  { %204 = shalt.err (!%p201_p2)
}
   0x9   :  { %s205_s21 = scalar_lea.vmem %s17_s13, 128  ;;  %p210_p4 = scmp.lt.s32.totalorder %s17_s13, %s17_s13 }
   0xa   :  { %p206_p3 = scmp.ne.s32.totalorder %s17_s13, %s205_s21  ;;  %p211_p5 = scmp.lt.s32.totalorder %s205_s21, %s205_s21 }
   0xc   :  { %p212_p6 = por %p211_p5, %p210_p4 }
   0xe   :  { %p213_p7 = pnand %p212_p6, %p206_p3 }
  0x10   :  { %216 = shalt.err (!%p213_p7)
}
  0x11   :  { %s268_s22 = smov 64   ;;  %s269_s23 = smov 4  }
  0x12   :  { %22 = dma.hbm_to_vmem [thread:$0]  %s351_s0, 128, %s17_s13, [#allocation3], %s268_s22, %s268_s22, %s269_s23  }
  0x13   :  { %s270_s26 = smov [#allocation5]   ;;  %s217_s30 = scalar_lea.hbm %s352_s1, 256 }
  0x14   :  { %s28_s27 = sshll.u32 %s270_s26, 4  ;;  %p218_p8 = scmp.ne.s32.totalorder %s352_s1, %s217_s30  ;;  %s29_s27 = int_to_ptr.vmem [resolvable:$true] %s28_s27 }
  0x15   :  { %p221_p9 = scmp.lt.u32.totalorder %s217_s30, %s352_s1 }
  0x17   :  { %p223_p10 = pnand %p221_p9, %p218_p8 }
  0x19   :  { %226 = shalt.err (!%p223_p10)
}
  0x1a   :  { %s227_s8 = scalar_lea.vmem %s29_s27, 256  ;;  %p232_p12 = scmp.lt.s32.totalorder %s29_s27, %s29_s27 }
  0x1b   :  { %p228_p11 = scmp.ne.s32.totalorder %s29_s27, %s227_s8  ;;  %p233_p13 = scmp.lt.s32.totalorder %s227_s8, %s227_s8 }
  0x1d   :  { %p234_p0 = por %p233_p13, %p232_p12 }
  0x1f   :  { %p235_p1 = pnand %p234_p0, %p228_p11 }
  0x21   :  { %238 = shalt.err (!%p235_p1)
}
  0x22   :  { %34 = dma.hbm_to_vmem [thread:$0]  %s352_s1, 256, %s29_s27, [#allocation6], %s268_s22, %s268_s22, %s269_s23  }
  0x23   :  { %261 = dma.done.wait [#allocation3], 128  }
  0x24   :  { %262 = vsyncadd [#allocation3], 4294967168 }
  0x25   :  { %263 = dma.done.wait [#allocation6], 256  }
  0x26   :  { %264 = vsyncadd [#allocation6], 4294967040  ;;  %v271_v0 = vmov 0.0   ;;  %vm272_vm0 = vmmov 0   ;;  %v192_v1 = vld [vmem:[#allocation5] sm:$0xff]   ;;  %v193_v2 = vld [vmem:[#allocation5 + $0x8] sm:$0xff]   ;;  %v52_v4 = vlaneseq }
  0x27   :  { %176 = vmatprep.subr.bf16.mxu0 %v271_v0  ;;  %180 = vmatprep.mubr.msk.bf16.mxu0 %vm272_vm0, %v271_v0  ;;  %v194_v3 = vld [vmem:[#allocation2] sm:$0xff]   ;;  %vm73_vm1 = vcmask 261120   ;;  %vm126_vm2 = vcmask 257024   ;;  %s273_s11 = smov 96  }
  0x28   :  { %177 = vmatpush3.bf16.msra.mxu0 %v192_v1  ;;  %v53_v5 = vshrl.u32 %v52_v4, 7  ;;  %v50_v6 = vld [vmem:[%s353_s2] sm:$0x1]  ;;  %s274_s2 = smov [#allocation7]  }
  0x29   :  { %178 = vmatprep.subr.bf16.mxu0 %v271_v0  ;;  %v51_v7 = vunpack.c.l.bf16 %v50_v6  ;;  %s152_s12 = sshll.u32 %s274_s2, 4  ;;  %s153_s12 = int_to_ptr.vmem [resolvable:$true] %s152_s12 }
  0x2a   :  { %v54_v8 = vsub.s32 0, %v53_v5  ;;  %s239_s13 = scalar_lea.vmem %s153_s12, 384  ;;  %p244_p3 = scmp.lt.s32.totalorder %s153_s12, %s153_s12 }
  0x2b   :  { %p240_p2 = scmp.ne.s32.totalorder %s153_s12, %s239_s13  ;;  %p245_p4 = scmp.lt.s32.totalorder %s239_s13, %s239_s13 }
  0x2c   :  { %179 = vmatpush3.bf16.msra.mxu0 %v193_v2  ;;  %v55_v9 = vrot.slane %v51_v7, %v54_v8 }
  0x2d   :  { %p246_p5 = por %p245_p4, %p244_p3 }
  0x2f   :  { %181 = vmatmul.mubr.msk.bf16.vlgmr.msra.gmra.mrb[0].mxu0 %vm73_vm1, %v194_v3  ;;  %p247_p6 = pnand %p246_p5, %p240_p2 }
 0x102   :  { %v111_v10 = vpop.f32.mrb[0].mxu0 }
 0x103   :  { %v112_v11 = vadd.f32 %v111_v10, %v55_v9  ;;  %v182_v12 = vpop.f32.mrb[1].mxu0 }
 0x104   :  { %v114_v13 = vpop.f32.mrb[2].mxu0 }
 0x105   :  { %v171_v14 = vpack.c.bf16 %v112_v11, %v112_v11  ;;  %v115_v15 = vadd.f32 %v114_v13, %v55_v9  ;;  %v183_v16 = vpop.f32.mrb[3].mxu0 }
 0x107   :  { %127 = vst.msk [vmem:[#allocation7] sm:$0xf] %vm126_vm2, %v171_v14  ;;  %v172_v17 = vpack.c.bf16 %v115_v15, %v115_v15  ;;  %138 = vrot.lane.b32.xlu1 %v171_v14, %s268_s22  ;;  %129 = vrot.lane.b32.xlu0 %v171_v14, %s273_s11 }
 0x109   :  { %128 = vst.msk [vmem:[#allocation7 + $0x4] sm:$0xf] %vm126_vm2, %v172_v17 }
 0x10b   :  { %140 = vrot.lane.b32.xlu1 %v172_v17, %s268_s22  ;;  %131 = vrot.lane.b32.xlu0 %v172_v17, %s273_s11 }
 0x179   :  { %v139_v18 = vpop.permute.xlu1 %138  ;;  %v130_v19 = vpop.permute.xlu0 %129 }
 0x17a   :  { %145 = vst.msk [vmem:[#allocation7 + $0x10] sm:$0xf] %vm126_vm2, %v139_v18  ;;  %136 = vst.msk [vmem:[#allocation7 + $0x8] sm:$0xf] %vm126_vm2, %v130_v19 }
 0x17d   :  { %v141_v20 = vpop.permute.xlu1 %140  ;;  %v132_v21 = vpop.permute.xlu0 %131 }
 0x17e   :  { %146 = vst.msk [vmem:[#allocation7 + $0x14] sm:$0xf] %vm126_vm2, %v141_v20  ;;  %137 = vst.msk [vmem:[#allocation7 + $0xc] sm:$0xf] %vm126_vm2, %v132_v21 }
 0x17f   :  { %250 = shalt.err (!%p247_p6)
}
 0x180   :  { %s251_s16 = scalar_lea.hbm %s354_s3, 384 }
 0x181   :  { %p252_p7 = scmp.ne.s32.totalorder %s354_s3, %s251_s16  ;;  %p255_p8 = scmp.lt.u32.totalorder %s251_s16, %s354_s3 }
 0x183   :  { %p257_p9 = pnand %p255_p8, %p252_p7 }
 0x185   :  { %260 = shalt.err (!%p257_p9)
}
 0x186   :  { %158 = dma.vmem_to_hbm [thread:$0]  %s153_s12, 384, %s354_s3, [#allocation4], %s268_s22, %s268_s22, %s269_s23  }
 0x187   :  { %265 = dma.done.wait [#allocation4], 384  }
 0x188   :  { %266 = vsyncadd [#allocation4], 4294966912 }
 0x189   :  { %162 = vsyncpa [#allocation3], 1 }
 0x18a   :  { %163 = vsyncpa [#allocation6], 1 }
 0x18b   :  { %164 = vsyncpa [#allocation4], 1 }

</bundles_post_ra>
